<compile_context>
chip_gen: v6e
topology: v6e:2x2x1
jax: 0.10.0
libtpu: 0.0.40
codegen_flags: <defaults>
</compile_context>

<pallas_src>
import functools

import numpy as np

import jax
import jax.numpy as jnp
from jax.experimental import pallas as pl
from jax.experimental.pallas import tpu as pltpu


def _yolo_head_kernel(p_ref, g_ref, c_ref, io_ref, *, use_const, use_raw):
    """Decode one (na*5, lane_tile) head-slab tile of one batch element.

    p_ref : (1, na*5, L)  raw conv outputs for channels [x, y, w, h, obj]
    g_ref : (2, L)        stride-scaled grid offsets [gx*stride ; gy*stride]
    c_ref : (na*5, 7)     per-row decode coefficients (trace-time constants)
    io_ref: (1, na*5, L)  decoded outputs (f32)
    """
    x = p_ref[0].astype(jnp.float32)          # (rows5, L), upcast in-kernel
    cst = c_ref[...]                          # (rows5, 7), f32

    a_sig = cst[:, 0:1]                       # sigmoid coefficient
    b_exp = cst[:, 1:2]                       # exp coefficient (anchor w/h, px)
    gx_c = cst[:, 2:3]                        # selects the grid-x row
    gy_c = cst[:, 3:4]                        # selects the grid-y row
    wh_m = cst[:, 4:5]                        # exp-input mask (kills overflow)

    sig = jax.nn.sigmoid(x)                   # EUP slot
    ex = jnp.exp(x * wh_m)                    # EUP slot; exp(0)=1 on masked rows

    gx = g_ref[0:1, :]                        # (1, L)
    gy = g_ref[1:2, :]

    out = a_sig * sig + b_exp * ex + gx_c * gx + gy_c * gy
    if use_const:                             # obj := 1 rows ('BCE'/'CE' arcs)
        out = out + cst[:, 5:6]
    if use_raw:                               # obj raw passthrough (other arcs)
        out = out + cst[:, 6:7] * x
    io_ref[0] = out


def _choose_lane_tile(hw, max_tile=1024):
    """Largest 128-multiple divisor of hw that is <= max_tile; else full hw."""
    if hw % 128 != 0:
        return hw                             # full-hw block fallback
    best = 128
    t = 128
    while t <= min(hw, max_tile):
        if hw % t == 0:
            best = t
        t += 128
    return best


def yolo_layer_forward(p_nchw, anchors, nc, img_size, arc="default",
                       want_raw_p=True):
    """Inference-mode YOLOLayer.forward. Returns (io.view(bs,-1,no), p_permuted)."""
    bs, ch, ny, nx = p_nchw.shape
    anchors_np = np.asarray(anchors, dtype=np.float32)
    na = anchors_np.shape[0]
    no = nc + 5
    assert ch == na * no, f"channel mismatch: {ch} != {na}*{no}"
    hw = ny * nx
    rows5 = na * 5
    stride = float(max(img_size)) / float(max(nx, ny))

    # ---- trace-time constant tables (no in-kernel iota / div / mod) --------
    cst = np.zeros((rows5, 7), np.float32)
    for a in range(na):
        r = a * 5
        cst[r + 0, 0] = stride; cst[r + 0, 2] = 1.0   # x: stride*sig + gx*stride
        cst[r + 1, 0] = stride; cst[r + 1, 3] = 1.0   # y: stride*sig + gy*stride
        cst[r + 2, 1] = anchors_np[a, 0]; cst[r + 2, 4] = 1.0  # w: exp*anchor_w_px
        cst[r + 3, 1] = anchors_np[a, 1]; cst[r + 3, 4] = 1.0  # h: exp*anchor_h_px
        if "default" in arc:
            cst[r + 4, 0] = 1.0                       # obj: sigmoid
        elif "BCE" in arc or "CE" in arc:
            cst[r + 4, 5] = 1.0                       # obj: 1
        else:
            cst[r + 4, 6] = 1.0                       # obj: raw passthrough
    use_const = bool(np.any(cst[:, 5]))
    use_raw = bool(np.any(cst[:, 6]))

    gy_np, gx_np = np.meshgrid(np.arange(ny), np.arange(nx), indexing="ij")
    grid_tbl = (np.stack([gx_np.reshape(-1), gy_np.reshape(-1)], axis=0)
                .astype(np.float32) * stride)          # (2, hw), stride-scaled

    # ---- head slab: channels [x,y,w,h,obj] per anchor, channel-major -------
    p_r = p_nchw.reshape(bs, na, no, hw)
    p_head = p_r[:, :, :5, :].reshape(bs, rows5, hw)   # native dtype

    lane_tile = _choose_lane_tile(hw)
    n_tiles = hw // lane_tile

    kernel = functools.partial(_yolo_head_kernel,
                               use_const=use_const, use_raw=use_raw)

    head = pl.pallas_call(
        kernel,
        out_shape=jax.ShapeDtypeStruct((bs, rows5, hw), jnp.float32),
        grid=(bs, n_tiles),
        in_specs=[
            pl.BlockSpec((1, rows5, lane_tile), lambda b, t: (b, 0, t)),
            pl.BlockSpec((2, lane_tile), lambda b, t: (0, t)),
            pl.BlockSpec((rows5, 7), lambda b, t: (0, 0)),
        ],
        out_specs=pl.BlockSpec((1, rows5, lane_tile), lambda b, t: (b, 0, t)),
        compiler_params=pltpu.CompilerParams(
            dimension_semantics=("parallel", "parallel")),
        # Blocks are a few hundred KB at most -> default scoped VMEM suffices
        # on v5e/v6e/v7x; sweep pl.Buffered(3) only if profiling shows exposed
        # DMA for very small heads.
    )(p_head, jnp.asarray(grid_tbl), jnp.asarray(cst))

    # ---- class channels: XLA glue (never enter the kernel for 'default') ---
    # TODO(synk): 'BCE'/'CE' class transforms stay as XLA elementwise/softmax
    # glue rather than Pallas (rare paths; softmax over no=nc+1 channels would
    # need misaligned cross-sublane reductions in-kernel).
    if "default" in arc:
        cls = p_r[:, :, 5:, :].astype(jnp.float32)
    elif "BCE" in arc:
        cls = jax.nn.sigmoid(p_r[:, :, 5:, :].astype(jnp.float32))
    elif "CE" in arc:
        sm = jax.nn.softmax(p_r[:, :, 4:, :].astype(jnp.float32), axis=2)
        cls = sm[:, :, 1:, :]
    else:
        cls = p_r[:, :, 5:, :].astype(jnp.float32)
    if nc == 1:
        cls = jnp.ones_like(cls)

    io_cm = jnp.concatenate([head.reshape(bs, na, 5, hw), cls], axis=2)
    io_out = jnp.transpose(io_cm, (0, 1, 3, 2)).reshape(bs, na * hw, no)

    # Training-style permuted raw tensor (module return convention). Optional
    # so callers that only need io can skip this extra HBM-heavy transpose.
    p_out = None
    if want_raw_p:
        p_out = jnp.transpose(p_nchw.reshape(bs, na, no, ny, nx),
                              (0, 1, 3, 4, 2))
    return io_out, p_out


def yolo_layer_reference(p_nchw, anchors, nc, img_size, arc="default"):
    """Pure-JAX reference mirroring the PyTorch forward (inference, non-ONNX)."""
    bs, ch, ny, nx = p_nchw.shape
    na = anchors.shape[0]
    no = nc + 5
    stride = float(max(img_size)) / float(max(nx, ny))
    p = jnp.transpose(p_nchw.reshape(bs, na, no, ny, nx), (0, 1, 3, 4, 2))
    p = p.astype(jnp.float32)
    yv, xv = jnp.meshgrid(jnp.arange(ny), jnp.arange(nx), indexing="ij")
    grid_xy = jnp.stack([xv, yv], axis=2).reshape(1, 1, ny, nx, 2).astype(jnp.float32)
    anchor_wh = (anchors.astype(jnp.float32) / stride).reshape(1, na, 1, 1, 2)

    xy = (jax.nn.sigmoid(p[..., :2]) + grid_xy) * stride
    wh = jnp.exp(p[..., 2:4]) * anchor_wh * stride
    tail = p[..., 4:]
    if "default" in arc:
        conf = jax.nn.sigmoid(tail[..., 0:1])
        cls = tail[..., 1:]
    elif "BCE" in arc:
        conf = jnp.ones_like(tail[..., 0:1])
        cls = jax.nn.sigmoid(tail[..., 1:])
    elif "CE" in arc:
        sm = jax.nn.softmax(tail, axis=4)
        conf = jnp.ones_like(tail[..., 0:1])
        cls = sm[..., 1:]
    else:
        conf = tail[..., 0:1]
        cls = tail[..., 1:]
    if nc == 1:
        cls = jnp.ones_like(cls)
    io = jnp.concatenate([xy, wh, conf, cls], axis=-1)
    p_raw = jnp.transpose(p_nchw.reshape(bs, na, no, ny, nx), (0, 1, 3, 4, 2))
    return io.reshape(bs, -1, no), p_raw


if __name__ == "__main__":
    # Deterministic synthetic config (no checkpoint): 3 anchors, 3 classes.
    anchors = jnp.array([[10.0, 13.0], [16.0, 30.0], [33.0, 23.0]], jnp.float32)
    nc = 3
    na = anchors.shape[0]
    no = nc + 5                      # 8
    bs, ny, nx = 2, 16, 16
    img_size = (512, 512)            # -> stride = 512 / 16 = 32

    key = jax.random.PRNGKey(0)
    p = jax.random.normal(key, (bs, na * no, ny, nx), dtype=jnp.float32)

    for arc in ("default", "BCE", "CE"):
        io, p_perm = yolo_layer_forward(p, anchors, nc, img_size, arc)
        io = jax.block_until_ready(io)
        p_perm = jax.block_until_ready(p_perm)

        io_ref, p_raw_ref = yolo_layer_reference(p, anchors, nc, img_size, arc)
        assert io.shape == (bs, na * ny * nx, no), arc
        assert p_perm.shape == (bs, na, ny, nx, no), arc
        assert jnp.allclose(io, io_ref, rtol=1e-5, atol=1e-5), arc
        assert jnp.allclose(p_perm, p_raw_ref, rtol=1e-6, atol=1e-6), arc

    print("KERNEL_OK")

    # TODO(synk): training path (return raw permuted p only) and ONNX_EXPORT
    # branch are not implemented as kernels; only the inference decode is.
</pallas_src>

<mosaic_0001>
module attributes {stable_mosaic.version = 11 : i64} {
  func.func @_yolo_head_kernel(%arg0: i32, %arg1: i32, %arg2: memref<1x15x256xf32, #tpu.memory_space<vmem>>, %arg3: memref<2x256xf32, #tpu.memory_space<vmem>>, %arg4: memref<15x7xf32, #tpu.memory_space<vmem>>, %arg5: memref<1x15x256xf32, #tpu.memory_space<vmem>>) attributes {dimension_semantics = [#tpu.dimension_semantics<parallel>, #tpu.dimension_semantics<parallel>], iteration_bounds = array<i64: 2, 1>, scalar_prefetch = 0 : i64, scratch_operands = 0 : i64, tpu.core_type = #tpu.core_type<tc>, window_params = [{transform_indices = @transform_0, window_bounds = array<i64: 1, 15, 256>}, {transform_indices = @transform_1, window_bounds = array<i64: 2, 256>}, {pipeline_mode = #tpu.pipeline_mode<synchronous>, transform_indices = @transform_2, window_bounds = array<i64: 15, 7>}, {transform_indices = @transform_3, window_bounds = array<i64: 1, 15, 256>}]} {
    %c0 = arith.constant 0 : index
    %c0_0 = arith.constant 0 : index
    %c0_1 = arith.constant 0 : index
    %0 = vector.load %arg2[%c0, %c0_0, %c0_1] : memref<1x15x256xf32, #tpu.memory_space<vmem>>, vector<1x15x256xf32>
    %1 = vector.shape_cast %0 : vector<1x15x256xf32> to vector<15x256xf32>
    %c0_2 = arith.constant 0 : index
    %c0_3 = arith.constant 0 : index
    %2 = vector.load %arg4[%c0_2, %c0_3] : memref<15x7xf32, #tpu.memory_space<vmem>>, vector<15x7xf32>
    %3 = vector.extract_strided_slice %2 {offsets = [0, 0], sizes = [15, 1], strides = [1, 1]} : vector<15x7xf32> to vector<15x1xf32>
    %4 = vector.extract_strided_slice %2 {offsets = [0, 1], sizes = [15, 1], strides = [1, 1]} : vector<15x7xf32> to vector<15x1xf32>
    %5 = vector.extract_strided_slice %2 {offsets = [0, 2], sizes = [15, 1], strides = [1, 1]} : vector<15x7xf32> to vector<15x1xf32>
    %6 = vector.extract_strided_slice %2 {offsets = [0, 3], sizes = [15, 1], strides = [1, 1]} : vector<15x7xf32> to vector<15x1xf32>
    %7 = vector.extract_strided_slice %2 {offsets = [0, 4], sizes = [15, 1], strides = [1, 1]} : vector<15x7xf32> to vector<15x1xf32>
    %8 = arith.negf %1 : vector<15x256xf32>
    %9 = math.exp %8 : vector<15x256xf32>
    %cst = arith.constant 1.000000e+00 : f32
    %10 = vector.broadcast %cst : f32 to vector<15x256xf32>
    %11 = arith.addf %10, %9 : vector<15x256xf32>
    %12 = arith.divf %10, %11 : vector<15x256xf32>
    %13 = vector.broadcast %7 : vector<15x1xf32> to vector<15x256xf32>
    %14 = arith.mulf %1, %13 : vector<15x256xf32>
    %15 = math.exp %14 : vector<15x256xf32>
    %c0_4 = arith.constant 0 : index
    %c0_5 = arith.constant 0 : index
    %16 = vector.load %arg3[%c0_4, %c0_5] : memref<2x256xf32, #tpu.memory_space<vmem>>, vector<1x256xf32>
    %c1 = arith.constant 1 : index
    %c0_6 = arith.constant 0 : index
    %17 = vector.load %arg3[%c1, %c0_6] : memref<2x256xf32, #tpu.memory_space<vmem>>, vector<1x256xf32>
    %18 = vector.broadcast %3 : vector<15x1xf32> to vector<15x256xf32>
    %19 = arith.mulf %18, %12 : vector<15x256xf32>
    %20 = vector.broadcast %4 : vector<15x1xf32> to vector<15x256xf32>
    %21 = arith.mulf %20, %15 : vector<15x256xf32>
    %22 = arith.addf %19, %21 : vector<15x256xf32>
    %23 = vector.broadcast %5 : vector<15x1xf32> to vector<15x256xf32>
    %24 = vector.broadcast %16 : vector<1x256xf32> to vector<15x256xf32>
    %25 = arith.mulf %23, %24 : vector<15x256xf32>
    %26 = arith.addf %22, %25 : vector<15x256xf32>
    %27 = vector.broadcast %6 : vector<15x1xf32> to vector<15x256xf32>
    %28 = vector.broadcast %17 : vector<1x256xf32> to vector<15x256xf32>
    %29 = arith.mulf %27, %28 : vector<15x256xf32>
    %30 = arith.addf %26, %29 : vector<15x256xf32>
    %c0_7 = arith.constant 0 : index
    %c0_8 = arith.constant 0 : index
    %c0_9 = arith.constant 0 : index
    %31 = vector.load %arg5[%c0_7, %c0_8, %c0_9] : memref<1x15x256xf32, #tpu.memory_space<vmem>>, vector<1x15x256xf32>
    %32 = vector.shape_cast %31 : vector<1x15x256xf32> to vector<15x256xf32>
    %33 = vector.shape_cast %30 : vector<15x256xf32> to vector<1x15x256xf32>
    tpu.vector_store %arg5[%c0_7, %c0_8, %c0_9], %33 {strides = array<i32>} : memref<1x15x256xf32, #tpu.memory_space<vmem>>, vector<1x15x256xf32>,
    return
  }
  func.func @transform_0(%arg0: i32, %arg1: i32) -> (i32, i32, i32) {
    %c0_i32 = arith.constant 0 : i32
    %c0_i32_0 = arith.constant 0 : i32
    return %arg0, %c0_i32, %arg1 : i32, i32, i32
  }
  func.func @transform_1(%arg0: i32, %arg1: i32) -> (i32, i32) {
    %c0_i32 = arith.constant 0 : i32
    %c0_i32_0 = arith.constant 0 : i32
    return %c0_i32, %arg1 : i32, i32
  }
  func.func @transform_2(%arg0: i32, %arg1: i32) -> (i32, i32) {
    %c0_i32 = arith.constant 0 : i32
    %c0_i32_0 = arith.constant 0 : i32
    %c0_i32_1 = arith.constant 0 : i32
    return %c0_i32, %c0_i32_0 : i32, i32
  }
  func.func @transform_3(%arg0: i32, %arg1: i32) -> (i32, i32, i32) {
    %c0_i32 = arith.constant 0 : i32
    %c0_i32_0 = arith.constant 0 : i32
    return %arg0, %c0_i32, %arg1 : i32, i32, i32
  }
}

</mosaic_0001>

<bundles_post_ra>
// kernel: tpu_custom_call.1
= control target key start
LH: loop header
LB: loop body
LE: loop exit
PB: predicated region body
PF: predicated region fallthrough
CT: control target
= control target key end

     0   :  { %s604_s12 = smov 0   ;;  %s606_s13 = smov 0   ;;  %s660_s0 = inlined_call_operand.vmem [shape: f32[2,15,256], index: 0, kind: input, shape index: {}]   ;;  %s661_s1 = inlined_call_operand.vmem [shape: f32[2,256], index: 1, kind: input, shape index: {}]   ;;  %s662_s2 = inlined_call_operand.vmem [shape: f32[15,7], index: 2, kind: input, shape index: {}]   ;;  %s663_s3 = inlined_call_operand.vmem [shape: f32[2,15,256], index: 3, kind: output, shape index: {}]  }
   0x1   :  { %s608_s14 = smov 0  }
   0x2 LB: > { %s25_s15 = sadd.s32 1, %s573_s13  ;;  %p480_p0 = scmp.ge.s32.totalorder %s577_s14, 1  ;;  %s577_s14 = sphi %s608_s14, %s13_s14   ;;  %s573_s13 = sphi %s606_s13, %s665_s13   ;;  %s569_s12 = sphi %s604_s12, %s664_s12  }
   0x3   : > { %p27_p1 = scmp.ge.s32.totalorder %s25_s15, 2  ;;  %p169_p2 = scmp.lt.s32.totalorder %s577_s14, 3 }
   0x5   : > { %s667_s15 = smov (%p27_p1, %s25_s15), 0  ;;  %p170_p3 = pnand %p480_p0, %p169_p2 }
   0x6   : > { %p207_p4 = scmp.lt.s32.totalorder (!%p170_p3), %s569_s12, 1 }
   0x7   : > { %173 = sbr.rel (%p170_p3) target bundleno = 170 (0xaa), region = 32 }
   0xc   : > { %v236_v0 = vld [vmem:[%s662_s2] sm:$0xff]  ;;  %v579_v1 = vmov 0   ;;  %v580_v2 = vmov 4   ;;  %v237_v3 = vld [vmem:[%s662_s2 + $0x8] sm:$0x7f]  ;;  %v581_v4 = vmov 1   ;;  %v324_v32 = vlaneseq }
   0xd   : > { %524 = vset.pattern.permute.xlu1 %v579_v1  ;;  %523 = vset.pattern.permute.xlu0 %v580_v2  ;;  %v582_v5 = vmov 2   ;;  %v583_v6 = vmov 3   ;;  %s669_s12 = smov (!%p207_p4, %s569_s12), 1  ;;  %v284_v40 = vld [vmem:[%s661_s1] ss:$2 sm:$0x3] }
   0xe   : > { %288 = vperm.xlu1 %524, %v236_v0   ;;  %264 = vperm.xlu0 %523, %v236_v0   ;;  %s492_s20 = sshll.u32 %s669_s12, 5  ;;  %v325_v37 = vshrl.u32 %v324_v32, 7  ;;  %v489_v42 = vld [vmem:[%s661_s1 + $0x1] ss:$2 sm:$0x3] }
   0xf   : > { %s214_s23 = scalar_lea.vmem %s660_s0, %s492_s20  ;;  %s230_s30 = scalar_lea.vmem %s663_s3, %s492_s20 }
  0x10   : > { %v232_v7 = vld [vmem:[%s214_s23] sm:$0xff]  ;;  %v233_v8 = vld [vmem:[%s214_s23 + $0x8] sm:$0xff]  ;;  %v234_v11 = vld [vmem:[%s214_s23 + $0x10] sm:$0x7f]  ;;  %v326_v38 = vsub.s32 0, %v325_v37  ;;  %v330_v39 = vsub.s32 1, %v325_v37 }
  0x11   : > { %v485_v9 = vmul.f32 -1.442695, %v232_v7  ;;  %v486_v10 = vmul.f32 -1.442695, %v233_v8  ;;  %v235_v12 = vld [vmem:[%s214_s23 + $0x18] sm:$0x7f] }
  0x12   : > { %292 = vperm.xlu1 %524, %v237_v3   ;;  %269 = vperm.xlu0 %523, %v237_v3   ;;  %v487_v13 = vmul.f32 -1.442695, %v234_v11  ;;  %v488_v14 = vmul.f32 -1.442695, %v235_v12  ;;  %v327_v46 = vrot.slane %v284_v40, %v326_v38  ;;  %v354_v47 = vrot.slane %v489_v42, %v326_v38 }
  0x13   : > { %531 = vpow2.f32 %v485_v9  ;;  %v331_v49 = vrot.slane %v284_v40, %v330_v39  ;;  %v358_v50 = vrot.slane %v489_v42, %v330_v39 }
  0x14   : > { %533 = vpow2.f32 %v486_v10 }
  0x15   : > { %535 = vpow2.f32 %v487_v13 }
  0x16   : > { %526 = vset.pattern.permute.xlu1 %v581_v4  ;;  %525 = vset.pattern.permute.xlu0 %v581_v4  ;;  %537 = vpow2.f32 %v488_v14 }
  0x17   : > { %304 = vperm.xlu1 %526, %v237_v3   ;;  %300 = vperm.xlu0 %525, %v236_v0  }
  0x1b   : > { %527 = vset.pattern.permute.xlu1 %v582_v5  ;;  %528 = vset.pattern.permute.xlu0 %v582_v5 }
  0x1c   : > { %316 = vperm.xlu1 %527, %v236_v0   ;;  %320 = vperm.xlu0 %528, %v237_v3  }
  0x20   : > { %529 = vset.pattern.permute.xlu1 %v583_v6  ;;  %530 = vset.pattern.permute.xlu0 %v583_v6  ;;  %v532_v15 = vpop.eup %531 }
  0x21   : > { %343 = vperm.xlu1 %529, %v236_v0   ;;  %v534_v16 = vpop.eup %533  ;;  %v250_v17 = vadd.f32 1.0, %v532_v15 }
  0x22   : > { %v536_v18 = vpop.eup %535  ;;  %v251_v20 = vadd.f32 1.0, %v534_v16 }
  0x23   : > { %v538_v22 = vpop.eup %537  ;;  %539 = vrcp.f32 %v250_v17  ;;  %v252_v27 = vadd.f32 1.0, %v536_v18 }
  0x24   : > { %541 = vrcp.f32 %v251_v20  ;;  %v253_v28 = vadd.f32 1.0, %v538_v22 }
  0x25   : > { %347 = vperm.xlu1 %529, %v237_v3  }
  0x30   : > { %v540_v43 = vpop.eup %539 }
  0x31   : > { %v542_v45 = vpop.eup %541 }
  0x89   : > { %v289_v19 = vpop.permute.xlu1 %288  ;;  %v265_v21 = vpop.permute.xlu0 %264 }
  0x8a   : > { %v272_v23 = vmul.f32 %v265_v21, %v232_v7  ;;  %v273_v24 = vmul.f32 %v265_v21, %v233_v8  ;;  %v295_v52 = vmul.f32 %v540_v43, %v289_v19  ;;  %v296_v56 = vmul.f32 %v542_v45, %v289_v19 }
  0x8c   : > { %v276_v25 = vmul.f32 1.442695, %v272_v23  ;;  %v278_v26 = vmul.f32 1.442695, %v273_v24 }
  0x8d   : > { %v270_v29 = vpop.permute.xlu0 %269  ;;  %v293_v30 = vpop.permute.xlu1 %292 }
  0x8e   : > { %543 = vpow2.f32 %v276_v25  ;;  %v274_v31 = vmul.f32 %v270_v29, %v234_v11  ;;  %v275_v33 = vmul.f32 %v270_v29, %v235_v12 }
  0x8f   : > { %545 = vpow2.f32 %v278_v26 }
  0x90   : > { %547 = vrcp.f32 %v252_v27  ;;  %v280_v34 = vmul.f32 1.442695, %v274_v31  ;;  %v282_v35 = vmul.f32 1.442695, %v275_v33 }
  0x91   : > { %549 = vrcp.f32 %v253_v28 }
  0x92   : > { %551 = vpow2.f32 %v280_v34  ;;  %v305_v36 = vpop.permute.xlu1 %304  ;;  %v301_v44 = vpop.permute.xlu0 %300 }
  0x93   : > { %553 = vpow2.f32 %v282_v35 }
  0x97   : > { %v317_v41 = vpop.permute.xlu1 %316  ;;  %v321_v58 = vpop.permute.xlu0 %320 }
  0x98   : > { %v334_v60 = vmul.f32 %v327_v46, %v317_v41  ;;  %v335_v0 = vmul.f32 %v331_v49, %v317_v41  ;;  %v336_v7 = vmul.f32 %v327_v46, %v321_v58  ;;  %v337_v12 = vmul.f32 %v331_v49, %v321_v58 }
  0x9b   : > { %v544_v48 = vpop.eup %543 }
  0x9c   : > { %v546_v51 = vpop.eup %545  ;;  %v307_v53 = vmul.f32 %v544_v48, %v301_v44  ;;  %v344_v54 = vpop.permute.xlu1 %343 }
  0x9d   : > { %v548_v55 = vpop.eup %547  ;;  %v308_v57 = vmul.f32 %v546_v51, %v301_v44  ;;  %v361_v62 = vmul.f32 %v354_v47, %v344_v54  ;;  %v362_v2 = vmul.f32 %v358_v50, %v344_v54 }
  0x9e   : > { %v550_v59 = vpop.eup %549  ;;  %v311_v61 = vadd.f32 %v307_v53, %v295_v52  ;;  %v297_v4 = vmul.f32 %v548_v55, %v293_v30 }
  0x9f   : > { %v552_v63 = vpop.eup %551  ;;  %v312_v1 = vadd.f32 %v308_v57, %v296_v56  ;;  %v298_v8 = vmul.f32 %v550_v59, %v293_v30 }
  0xa0   : > { %v554_v3 = vpop.eup %553  ;;  %v309_v5 = vmul.f32 %v552_v63, %v305_v36  ;;  %v338_v6 = vadd.f32 %v334_v60, %v311_v61  ;;  %v348_v11 = vpop.permute.xlu1 %347 }
  0xa1   : > { %v310_v9 = vmul.f32 %v554_v3, %v305_v36  ;;  %v339_v10 = vadd.f32 %v335_v0, %v312_v1  ;;  %v363_v17 = vmul.f32 %v354_v47, %v348_v11  ;;  %v364_v19 = vmul.f32 %v358_v50, %v348_v11 }
  0xa2   : > { %v313_v13 = vadd.f32 %v309_v5, %v297_v4  ;;  %v365_v14 = vadd.f32 %v361_v62, %v338_v6 }
  0xa3   : > { %v314_v15 = vadd.f32 %v310_v9, %v298_v8  ;;  %v366_v16 = vadd.f32 %v362_v2, %v339_v10 }
  0xa4   : > { %369 = vst [vmem:[%s230_s30] sm:$0xff] %v365_v14  ;;  %v340_v18 = vadd.f32 %v336_v7, %v313_v13 }
  0xa5   : > { %370 = vst [vmem:[%s230_s30 + $0x8] sm:$0xff] %v366_v16  ;;  %v341_v20 = vadd.f32 %v337_v12, %v314_v15 }
  0xa6   : > { %v367_v21 = vadd.f32 %v363_v17, %v340_v18 }
  0xa7   : > { %v368_v22 = vadd.f32 %v364_v19, %v341_v20 }
  0xa8   : > { %371 = vst [vmem:[%s230_s30 + $0x10] sm:$0x7f] %v367_v21 }
  0xa9   : > { %372 = vst [vmem:[%s230_s30 + $0x18] sm:$0x7f] %v368_v22 }
  0xaa PF: > { %s13_s14 = sadd.s32 1, %s577_s14   ;;  %s664_s12 = smov %s573_s13 }
  0xab   : > { %p10_p5 = scmp.ge.s32.totalorder %s13_s14, 4   ;;  %s665_s13 = smov %s667_s15 }
  0xad   :  { %12 = sbr.rel (!%p10_p5) target bundleno = 2 (0x2), region = 66 }

</bundles_post_ra>
